<compile_context>
chip_gen: v6e
topology: v6e:2x2x1
jax: 0.10.0
libtpu: 0.0.40
codegen_flags: <defaults>
</compile_context>

<pallas_src>
import jax
import jax.numpy as jnp
from jax.experimental import pallas as pl
from jax.experimental.pallas import tpu as pltpu

EMBEDDING_SIZE = 1280
HIDDEN1 = 128
HIDDEN2 = 64
LANES = 128
MAX_BLOCK_M = 512  # safe tile height on v5e / v6e / v7x


def _round_up(x, m):
    return ((x + m - 1) // m) * m


def _classifier_kernel(x_ref, w1_ref, b1_ref, w2_ref, b2_ref, w3_ref, b3_ref, o_ref):
    # Linear(1280 -> 128) + bias + ReLU  (bf16 operands, f32 MXU accumulation)
    h1 = jnp.dot(x_ref[...], w1_ref[...], preferred_element_type=jnp.float32)
    h1 = jnp.maximum(h1 + b1_ref[...], 0.0)
    # Dropout(p=0.5) is identity at inference time.
    # Linear(128 -> 64, lane-padded to 128) + bias + ReLU
    h2 = jnp.dot(h1.astype(jnp.bfloat16), w2_ref[...],
                 preferred_element_type=jnp.float32)
    h2 = jnp.maximum(h2 + b2_ref[...], 0.0)
    # Linear(64 -> C, both lane-padded to 128)
    out = jnp.dot(h2.astype(jnp.bfloat16), w3_ref[...],
                  preferred_element_type=jnp.float32)
    o_ref[...] = (out + b3_ref[...]).astype(o_ref.dtype)


def perch_classifier_pallas(embeddings, params, *, block_m=MAX_BLOCK_M):
    """Run the fused MLP classifier head as a batch-tiled Pallas call.

    embeddings: [B, 1280] float32 (or bf16)
    params: dict with w1 [1280,128], b1 [1,128], w2 [128,64], b2 [1,64],
            w3 [64,C], b3 [1,C]
    returns logits [B, C] float32
    """
    B = embeddings.shape[0]
    C = params["w3"].shape[1]

    # Lane-pad the narrow tail so every store / MXU op is lane-dense.
    h2p = _round_up(HIDDEN2, LANES)
    cp = _round_up(C, LANES)

    w1 = params["w1"].astype(jnp.bfloat16)
    b1 = params["b1"].astype(jnp.float32)
    w2 = jnp.zeros((HIDDEN1, h2p), jnp.bfloat16).at[:, :HIDDEN2].set(
        params["w2"].astype(jnp.bfloat16))
    b2 = jnp.zeros((1, h2p), jnp.float32).at[:, :HIDDEN2].set(
        params["b2"].astype(jnp.float32))
    w3 = jnp.zeros((h2p, cp), jnp.bfloat16).at[:HIDDEN2, :C].set(
        params["w3"].astype(jnp.bfloat16))
    b3 = jnp.zeros((1, cp), jnp.float32).at[:, :C].set(
        params["b3"].astype(jnp.float32))

    # Batch tile: stream TM-row tiles of the embedding matrix through VMEM.
    tm = min(block_m, _round_up(B, 8))
    bp = _round_up(B, tm)
    x = embeddings.astype(jnp.bfloat16)
    if bp != B:
        x = jnp.pad(x, ((0, bp - B), (0, 0)))

    grid = (bp // tm,)

    weight_bytes = 2 * (EMBEDDING_SIZE * HIDDEN1 + HIDDEN1 * h2p + h2p * cp)
    cost = pl.CostEstimate(
        flops=2 * bp * (EMBEDDING_SIZE * HIDDEN1 + HIDDEN1 * h2p + h2p * cp),
        transcendentals=0,
        bytes_accessed=bp * EMBEDDING_SIZE * 2 + bp * cp * 4 + weight_bytes,
    )

    out = pl.pallas_call(
        _classifier_kernel,
        out_shape=jax.ShapeDtypeStruct((bp, cp), jnp.float32),
        grid=grid,
        in_specs=[
            pl.BlockSpec((tm, EMBEDDING_SIZE), lambda i: (i, 0)),   # embeddings tile
            pl.BlockSpec((EMBEDDING_SIZE, HIDDEN1), lambda i: (0, 0)),  # w1 (resident)
            pl.BlockSpec((1, HIDDEN1), lambda i: (0, 0)),               # b1
            pl.BlockSpec((HIDDEN1, h2p), lambda i: (0, 0)),             # w2
            pl.BlockSpec((1, h2p), lambda i: (0, 0)),                   # b2
            pl.BlockSpec((h2p, cp), lambda i: (0, 0)),                  # w3
            pl.BlockSpec((1, cp), lambda i: (0, 0)),                    # b3
        ],
        out_specs=pl.BlockSpec((tm, cp), lambda i: (i, 0)),
        compiler_params=pltpu.CompilerParams(
            dimension_semantics=("parallel",),
            vmem_limit_bytes=32 * 1024 * 1024,
        ),
        cost_estimate=cost,
    )(x, w1, b1, w2, b2, w3, b3)

    return out[:B, :C]


def init_classifier_params(key, num_classes):
    """Deterministic init matching torch.nn.Linear default (U(-1/sqrt(fan_in), +))."""
    def linear(key, fan_in, fan_out):
        kw, kb = jax.random.split(key)
        bound = 1.0 / jnp.sqrt(fan_in)
        w = jax.random.uniform(kw, (fan_in, fan_out), jnp.float32, -bound, bound)
        b = jax.random.uniform(kb, (1, fan_out), jnp.float32, -bound, bound)
        return w, b

    k1, k2, k3 = jax.random.split(key, 3)
    w1, b1 = linear(k1, EMBEDDING_SIZE, HIDDEN1)
    w2, b2 = linear(k2, HIDDEN1, HIDDEN2)
    w3, b3 = linear(k3, HIDDEN2, num_classes)
    return {"w1": w1, "b1": b1, "w2": w2, "b2": b2, "w3": w3, "b3": b3}


def perch_forward(input_values, params):
    """Mirror of PerchModel.forward glue (plain JAX), kernel for the classifier.

    input_values: [B, E] embeddings (TF-Hub backbone is external, see TODO),
                  or [B, 1, E] which gets squeezed like the torch code.
    """
    if input_values.ndim > 2:
        input_values = jnp.squeeze(input_values, axis=1)
    # TF model path: input_tensor.reshape([-1, last_dim]) — already [B, E] here.
    embeddings = input_values.reshape(-1, input_values.shape[-1])
    return perch_classifier_pallas(embeddings, params)


def _reference(embeddings, params):
    # Matches kernel numerics: bf16 operands, f32 accumulation.
    x = embeddings.astype(jnp.bfloat16)
    w1 = params["w1"].astype(jnp.bfloat16)
    w2 = params["w2"].astype(jnp.bfloat16)
    w3 = params["w3"].astype(jnp.bfloat16)
    h1 = jnp.maximum(
        jnp.dot(x, w1, preferred_element_type=jnp.float32) + params["b1"], 0.0)
    h2 = jnp.maximum(
        jnp.dot(h1.astype(jnp.bfloat16), w2, preferred_element_type=jnp.float32)
        + params["b2"], 0.0)
    return (jnp.dot(h2.astype(jnp.bfloat16), w3, preferred_element_type=jnp.float32)
            + params["b3"])


if __name__ == "__main__":
    num_classes = 10
    batch = 8

    key = jax.random.PRNGKey(0)
    k_params, k_input = jax.random.split(key)

    params = init_classifier_params(k_params, num_classes)
    # Synthetic "embeddings" standing in for TF-Hub Perch output (shape [B, 1, 1280]
    # to exercise the squeeze path like the torch forward).
    embeddings = jax.random.normal(k_input, (batch, 1, EMBEDDING_SIZE), jnp.float32)

    logits = perch_forward(embeddings, params)
    logits = jax.block_until_ready(logits)

    ref = _reference(jnp.squeeze(embeddings, axis=1), params)
    assert logits.shape == (batch, num_classes)
    assert jnp.allclose(logits, ref, atol=2e-2, rtol=2e-2), "mismatch vs reference"

    print("KERNEL_OK")
</pallas_src>

<mosaic_0001>
module attributes {stable_mosaic.version = 11 : i64} {
  func.func @_classifier_kernel(%arg0: i32, %arg1: memref<8x1280xbf16, #tpu.memory_space<vmem>>, %arg2: memref<1280x128xbf16, #tpu.memory_space<vmem>>, %arg3: memref<1x128xf32, #tpu.memory_space<vmem>>, %arg4: memref<128x128xbf16, #tpu.memory_space<vmem>>, %arg5: memref<1x128xf32, #tpu.memory_space<vmem>>, %arg6: memref<128x128xbf16, #tpu.memory_space<vmem>>, %arg7: memref<1x128xf32, #tpu.memory_space<vmem>>, %arg8: memref<8x128xf32, #tpu.memory_space<vmem>>) attributes {dimension_semantics = [#tpu.dimension_semantics<parallel>], iteration_bounds = array<i64: 1>, scalar_prefetch = 0 : i64, scratch_operands = 0 : i64, tpu.core_type = #tpu.core_type<tc>, window_params = [{transform_indices = @transform_0, window_bounds = array<i64: 8, 1280>}, {pipeline_mode = #tpu.pipeline_mode<synchronous>, transform_indices = @transform_1, window_bounds = array<i64: 1280, 128>}, {pipeline_mode = #tpu.pipeline_mode<synchronous>, transform_indices = @transform_2, window_bounds = array<i64: 1, 128>}, {pipeline_mode = #tpu.pipeline_mode<synchronous>, transform_indices = @transform_3, window_bounds = array<i64: 128, 128>}, {pipeline_mode = #tpu.pipeline_mode<synchronous>, transform_indices = @transform_4, window_bounds = array<i64: 1, 128>}, {pipeline_mode = #tpu.pipeline_mode<synchronous>, transform_indices = @transform_5, window_bounds = array<i64: 128, 128>}, {pipeline_mode = #tpu.pipeline_mode<synchronous>, transform_indices = @transform_6, window_bounds = array<i64: 1, 128>}, {transform_indices = @transform_7, window_bounds = array<i64: 8, 128>}]} {
    %c0 = arith.constant 0 : index
    %c0_0 = arith.constant 0 : index
    %0 = vector.load %arg1[%c0, %c0_0] : memref<8x1280xbf16, #tpu.memory_space<vmem>>, vector<8x1280xbf16>
    %c0_1 = arith.constant 0 : index
    %c0_2 = arith.constant 0 : index
    %1 = vector.load %arg2[%c0_1, %c0_2] : memref<1280x128xbf16, #tpu.memory_space<vmem>>, vector<1280x128xbf16>
    %cst = arith.constant dense<0.000000e+00> : vector<8x128xf32>
    %2 = tpu.matmul %0, %1, %cst {dimension_numbers = #tpu.dot_dimension_numbers<[1], [0], [0], [1], [0, 0, 1, 1], [], []>} : vector<8x1280xbf16>, vector<1280x128xbf16>, vector<8x128xf32> -> vector<8x128xf32>
    %c0_3 = arith.constant 0 : index
    %c0_4 = arith.constant 0 : index
    %3 = vector.load %arg3[%c0_3, %c0_4] : memref<1x128xf32, #tpu.memory_space<vmem>>, vector<1x128xf32>
    %4 = vector.broadcast %3 : vector<1x128xf32> to vector<8x128xf32>
    %5 = arith.addf %2, %4 : vector<8x128xf32>
    %cst_5 = arith.constant 0.000000e+00 : f32
    %6 = vector.broadcast %cst_5 : f32 to vector<8x128xf32>
    %7 = arith.maximumf %5, %6 : vector<8x128xf32>
    %8 = arith.truncf %7 : vector<8x128xf32> to vector<8x128xbf16>
    %c0_6 = arith.constant 0 : index
    %c0_7 = arith.constant 0 : index
    %9 = vector.load %arg4[%c0_6, %c0_7] : memref<128x128xbf16, #tpu.memory_space<vmem>>, vector<128x128xbf16>
    %cst_8 = arith.constant dense<0.000000e+00> : vector<8x128xf32>
    %10 = tpu.matmul %8, %9, %cst_8 {dimension_numbers = #tpu.dot_dimension_numbers<[1], [0], [0], [1], [0, 0, 1, 1], [], []>} : vector<8x128xbf16>, vector<128x128xbf16>, vector<8x128xf32> -> vector<8x128xf32>
    %c0_9 = arith.constant 0 : index
    %c0_10 = arith.constant 0 : index
    %11 = vector.load %arg5[%c0_9, %c0_10] : memref<1x128xf32, #tpu.memory_space<vmem>>, vector<1x128xf32>
    %12 = vector.broadcast %11 : vector<1x128xf32> to vector<8x128xf32>
    %13 = arith.addf %10, %12 : vector<8x128xf32>
    %cst_11 = arith.constant 0.000000e+00 : f32
    %14 = vector.broadcast %cst_11 : f32 to vector<8x128xf32>
    %15 = arith.maximumf %13, %14 : vector<8x128xf32>
    %16 = arith.truncf %15 : vector<8x128xf32> to vector<8x128xbf16>
    %c0_12 = arith.constant 0 : index
    %c0_13 = arith.constant 0 : index
    %17 = vector.load %arg6[%c0_12, %c0_13] : memref<128x128xbf16, #tpu.memory_space<vmem>>, vector<128x128xbf16>
    %cst_14 = arith.constant dense<0.000000e+00> : vector<8x128xf32>
    %18 = tpu.matmul %16, %17, %cst_14 {dimension_numbers = #tpu.dot_dimension_numbers<[1], [0], [0], [1], [0, 0, 1, 1], [], []>} : vector<8x128xbf16>, vector<128x128xbf16>, vector<8x128xf32> -> vector<8x128xf32>
    %c0_15 = arith.constant 0 : index
    %c0_16 = arith.constant 0 : index
    %19 = vector.load %arg7[%c0_15, %c0_16] : memref<1x128xf32, #tpu.memory_space<vmem>>, vector<1x128xf32>
    %20 = vector.broadcast %19 : vector<1x128xf32> to vector<8x128xf32>
    %21 = arith.addf %18, %20 : vector<8x128xf32>
    %c0_17 = arith.constant 0 : index
    %c0_18 = arith.constant 0 : index
    %22 = vector.load %arg8[%c0_17, %c0_18] : memref<8x128xf32, #tpu.memory_space<vmem>>, vector<8x128xf32>
    tpu.vector_store %arg8[%c0_17, %c0_18], %21 {strides = array<i32>} : memref<8x128xf32, #tpu.memory_space<vmem>>, vector<8x128xf32>,
    return
  }
  func.func @transform_0(%arg0: i32) -> (i32, i32) {
    %c0_i32 = arith.constant 0 : i32
    %c0_i32_0 = arith.constant 0 : i32
    return %arg0, %c0_i32 : i32, i32
  }
  func.func @transform_1(%arg0: i32) -> (i32, i32) {
    %c0_i32 = arith.constant 0 : i32
    %c0_i32_0 = arith.constant 0 : i32
    %c0_i32_1 = arith.constant 0 : i32
    return %c0_i32, %c0_i32_0 : i32, i32
  }
  func.func @transform_2(%arg0: i32) -> (i32, i32) {
    %c0_i32 = arith.constant 0 : i32
    %c0_i32_0 = arith.constant 0 : i32
    %c0_i32_1 = arith.constant 0 : i32
    return %c0_i32, %c0_i32_0 : i32, i32
  }
  func.func @transform_3(%arg0: i32) -> (i32, i32) {
    %c0_i32 = arith.constant 0 : i32
    %c0_i32_0 = arith.constant 0 : i32
    %c0_i32_1 = arith.constant 0 : i32
    return %c0_i32, %c0_i32_0 : i32, i32
  }
  func.func @transform_4(%arg0: i32) -> (i32, i32) {
    %c0_i32 = arith.constant 0 : i32
    %c0_i32_0 = arith.constant 0 : i32
    %c0_i32_1 = arith.constant 0 : i32
    return %c0_i32, %c0_i32_0 : i32, i32
  }
  func.func @transform_5(%arg0: i32) -> (i32, i32) {
    %c0_i32 = arith.constant 0 : i32
    %c0_i32_0 = arith.constant 0 : i32
    %c0_i32_1 = arith.constant 0 : i32
    return %c0_i32, %c0_i32_0 : i32, i32
  }
  func.func @transform_6(%arg0: i32) -> (i32, i32) {
    %c0_i32 = arith.constant 0 : i32
    %c0_i32_0 = arith.constant 0 : i32
    %c0_i32_1 = arith.constant 0 : i32
    return %c0_i32, %c0_i32_0 : i32, i32
  }
  func.func @transform_7(%arg0: i32) -> (i32, i32) {
    %c0_i32 = arith.constant 0 : i32
    %c0_i32_0 = arith.constant 0 : i32
    return %arg0, %c0_i32 : i32, i32
  }
}

</mosaic_0001>

<bundles_post_ra>
// kernel: tpu_custom_call.1
= control target key start
LH: loop header
LB: loop body
LE: loop exit
PB: predicated region body
PF: predicated region fallthrough
CT: control target
= control target key end

     0   :  { %12 = vsyncpa [#allocation3], 0  ;;  %s1812_s0 = inlined_call_operand.hbm [shape: bf16[8,1280], index: 0, kind: input, shape index: {}]   ;;  %s1813_s1 = inlined_call_operand.hbm [shape: bf16[1280,128], index: 1, kind: input, shape index: {}]   ;;  %s1814_s2 = inlined_call_operand.vmem [shape: f32[1,128], index: 2, kind: input, shape index: {}]   ;;  %s1815_s3 = inlined_call_operand.hbm [shape: bf16[128,128], index: 3, kind: input, shape index: {}]   ;;  %s1816_s4 = inlined_call_operand.vmem [shape: f32[1,128], index: 4, kind: input, shape index: {}]   ;;  %s1817_s5 = inlined_call_operand.hbm [shape: bf16[128,128], index: 5, kind: input, shape index: {}]   ;;  %s1818_s6 = inlined_call_operand.vmem [shape: f32[1,128], index: 6, kind: input, shape index: {}]   ;;  %s1819_s7 = inlined_call_operand.hbm [shape: f32[8,128], index: 7, kind: output, shape index: {}]  }
   0x1   :  { %13 = vsyncpa [#allocation6], 0 }
   0x2   :  { %14 = vsyncpa [#allocation9], 0 }
   0x3   :  { %15 = vsyncpa [#allocation4], 0  ;;  %s1712_s24 = smov [#allocation5]  }
   0x4   :  { %s31_s25 = sshll.u32 %s1712_s24, 4  ;;  %s32_s25 = int_to_ptr.vmem [resolvable:$true] %s31_s25 }
   0x5   :  { %s1612_s26 = scalar_lea.vmem %s32_s25, 10240  ;;  %p1617_p1 = scmp.lt.s32.totalorder %s32_s25, %s32_s25 }
   0x6   :  { %p1613_p0 = scmp.ne.s32.totalorder %s32_s25, %s1612_s26  ;;  %p1618_p2 = scmp.lt.s32.totalorder %s1612_s26, %s1612_s26 }
   0x8   :  { %p1619_p3 = por %p1618_p2, %p1617_p1 }
   0xa   :  { %p1620_p4 = pnand %p1619_p3, %p1613_p0 }
   0xc   :  { %1623 = shalt.err (!%p1620_p4)
}
   0xd   :  { %s1713_s27 = smov 64   ;;  %s1714_s28 = smov 4  }
   0xe   :  { %37 = dma.hbm_to_vmem [thread:$0]  %s1813_s1, 10240, %s32_s25, [#allocation6], %s1713_s27, %s1713_s27, %s1714_s28  }
   0xf   :  { %s1715_s8 = smov [#allocation2]   ;;  %s1716_s10 = smov [#allocation7]  }
  0x10   :  { %s22_s9 = sshll.u32 %s1715_s8, 4  ;;  %s45_s11 = sshll.u32 %s1716_s10, 4  ;;  %s23_s9 = int_to_ptr.vmem [resolvable:$true] %s22_s9  ;;  %s46_s11 = int_to_ptr.vmem [resolvable:$true] %s45_s11 }
  0x11   :  { %s1632_s12 = scalar_lea.vmem %s23_s9, 640  ;;  %p1637_p6 = scmp.lt.s32.totalorder %s23_s9, %s23_s9 }
  0x12   :  { %p1633_p5 = scmp.ne.s32.totalorder %s23_s9, %s1632_s12  ;;  %p1638_p7 = scmp.lt.s32.totalorder %s1632_s12, %s1632_s12 }
  0x14   :  { %p1639_p8 = por %p1638_p7, %p1637_p6 }
  0x16   :  { %p1640_p9 = pnand %p1639_p8, %p1633_p5 }
  0x18   :  { %1643 = shalt.err (!%p1640_p9)
}
  0x19   :  { %25 = dma.hbm_to_vmem [thread:$0]  %s1812_s0, 640, %s23_s9, [#allocation3]  }
  0x1a   :  { %s1652_s15 = scalar_lea.vmem %s46_s11, 1024  ;;  %p1657_p11 = scmp.lt.s32.totalorder %s46_s11, %s46_s11 }
  0x1b   :  { %p1653_p10 = scmp.ne.s32.totalorder %s46_s11, %s1652_s15  ;;  %p1658_p12 = scmp.lt.s32.totalorder %s1652_s15, %s1652_s15 }
  0x1d   :  { %p1659_p13 = por %p1658_p12, %p1657_p11 }
  0x1f   :  { %p1660_p0 = pnand %p1659_p13, %p1653_p10 }
  0x21   :  { %1663 = shalt.err (!%p1660_p0)
}
  0x22   :  { %51 = dma.hbm_to_vmem [thread:$0]  %s1815_s3, 1024, %s46_s11, [#allocation6], %s1713_s27, %s1713_s27, %s1714_s28  }
  0x23   :  { %s1717_s17 = smov [#allocation8]  }
  0x24   :  { %s59_s18 = sshll.u32 %s1717_s17, 4  ;;  %s60_s18 = int_to_ptr.vmem [resolvable:$true] %s59_s18 }
  0x25   :  { %s1672_s19 = scalar_lea.vmem %s60_s18, 1024  ;;  %p1677_p2 = scmp.lt.s32.totalorder %s60_s18, %s60_s18 }
  0x26   :  { %p1673_p1 = scmp.ne.s32.totalorder %s60_s18, %s1672_s19  ;;  %p1678_p3 = scmp.lt.s32.totalorder %s1672_s19, %s1672_s19 }
  0x28   :  { %p1679_p4 = por %p1678_p3, %p1677_p2 }
  0x2a   :  { %p1680_p5 = pnand %p1679_p4, %p1673_p1 }
  0x2c   :  { %1683 = shalt.err (!%p1680_p5)
}
  0x2d   :  { %65 = dma.hbm_to_vmem [thread:$0]  %s1817_s5, 1024, %s60_s18, [#allocation9], %s1713_s27, %s1713_s27, %s1714_s28  }
  0x2e   :  { %1704 = dma.done.wait [#allocation3], 640  }
  0x2f   :  { %1705 = vsyncadd [#allocation3], 4294966656 }
  0x30   :  { %1706 = dma.done.wait [#allocation6], 11264  }
  0x31   :  { %1707 = vsyncadd [#allocation6], 4294956032 }
  0x32   :  { %1708 = dma.done.wait [#allocation9], 1024  }
  0x33   :  { %1709 = vsyncadd [#allocation9], 4294966272  ;;  %v1498_v0 = vld [vmem:[#allocation5 + $0x78] sm:$0xff]   ;;  %v1502_v4 = vld [vmem:[#allocation5 + $0x70] sm:$0xff]   ;;  %vm1719_vm0 = vmmov 0   ;;  %s1720_s24 = smov [#allocation10]  }
  0x34   :  { %v1499_v1 = vld [vmem:[#allocation5 + $0x38] sm:$0xff]   ;;  %1321 = vmatprep.subr.bf16.mxu0 %v1498_v0  ;;  %v1503_v5 = vld [vmem:[#allocation5 + $0x30] sm:$0xff]   ;;  %v1506_v8 = vld [vmem:[#allocation5 + $0x68] sm:$0xff]   ;;  %s1201_s25 = sshll.u32 %s1720_s24, 4  ;;  %s1202_s25 = int_to_ptr.vmem [resolvable:$true] %s1201_s25 }
  0x35   :  { %v1500_v2 = vld [vmem:[#allocation5 + $0xf8] sm:$0xff]   ;;  %1322 = vmatpush3.bf16.msra.mxu0 %v1499_v1  ;;  %v1504_v6 = vld [vmem:[#allocation5 + $0xf0] sm:$0xff]   ;;  %v1507_v9 = vld [vmem:[#allocation5 + $0x28] sm:$0xff]   ;;  %p1689_p7 = scmp.lt.s32.totalorder %s1202_s25, %s1202_s25 }
  0x36   :  { %v1501_v3 = vld [vmem:[#allocation5 + $0xb8] sm:$0xff]   ;;  %1343 = vmatprep.subr.bf16.mxu1 %v1500_v2  ;;  %1323 = vmatprep.subr.bf16.mxu0 %v1502_v4  ;;  %v1505_v7 = vld [vmem:[#allocation5 + $0xb0] sm:$0xff]   ;;  %v1508_v10 = vld [vmem:[#allocation5 + $0xe8] sm:$0xff]  }
  0x37   :  { %1344 = vmatpush3.bf16.msra.mxu1 %v1501_v3  ;;  %v1509_v11 = vld [vmem:[#allocation5 + $0xa8] sm:$0xff]   ;;  %v1510_v12 = vld [vmem:[#allocation5 + $0x60] sm:$0xff]   ;;  %v1514_v16 = vld [vmem:[#allocation5 + $0x58] sm:$0xff]  }
  0x38   :  { %1345 = vmatprep.subr.bf16.mxu1 %v1504_v6  ;;  %v1511_v13 = vld [vmem:[#allocation5 + $0x20] sm:$0xff]   ;;  %v1515_v17 = vld [vmem:[#allocation5 + $0x18] sm:$0xff]   ;;  %v1518_v20 = vld [vmem:[#allocation5 + $0x50] sm:$0xff]  }
  0x39   :  { %1324 = vmatpush3.bf16.msra.mxu0 %v1503_v5  ;;  %v1512_v14 = vld [vmem:[#allocation5 + $0xe0] sm:$0xff]   ;;  %v1516_v18 = vld [vmem:[#allocation5 + $0xd8] sm:$0xff]   ;;  %v1519_v21 = vld [vmem:[#allocation5 + $0x10] sm:$0xff]  }
  0x3a   :  { %1325 = vmatprep.subr.bf16.mxu0 %v1506_v8  ;;  %v1513_v15 = vld [vmem:[#allocation5 + $0xa0] sm:$0xff]   ;;  %v1517_v19 = vld [vmem:[#allocation5 + $0x98] sm:$0xff]   ;;  %v1520_v22 = vld [vmem:[#allocation5 + $0xd0] sm:$0xff]  }
  0x3b   :  { %1346 = vmatpush3.bf16.msra.mxu1 %v1505_v7  ;;  %v1521_v23 = vld [vmem:[#allocation5 + $0x90] sm:$0xff]   ;;  %v1522_v24 = vld [vmem:[#allocation5 + $0x48] sm:$0xff]   ;;  %v1526_v28 = vld [vmem:[#allocation5 + $0x40] sm:$0xff]  }
  0x3c   :  { %1347 = vmatprep.subr.bf16.mxu1 %v1508_v10  ;;  %v1523_v25 = vld [vmem:[#allocation5 + $0x8] sm:$0xff]   ;;  %v1527_v29 = vld [vmem:[#allocation5] sm:$0xff]   ;;  %v81_v31 = vld [vmem:[#allocation2] sm:$0xff] }
  0x3d   :  { %1326 = vmatpush3.bf16.msra.mxu0 %v1507_v9  ;;  %v1524_v26 = vld [vmem:[#allocation5 + $0xc8] sm:$0xff]   ;;  %v1528_v30 = vld [vmem:[#allocation5 + $0xc0] sm:$0xff]   ;;  %v1213_v32 = vcombine.low %v81_v31, %v81_v31  ;;  %v1214_v33 = vcombine.high %v81_v31, %v81_v31  ;;  %v1532_v35 = vld [vmem:[#allocation5 + $0x178] sm:$0xff]  }
  0x3e   :  { %1327 = vmatprep.subr.bf16.mxu0 %v1510_v12  ;;  %v1525_v27 = vld [vmem:[#allocation5 + $0x88] sm:$0xff]   ;;  %v1531_v34 = vld [vmem:[#allocation5 + $0x80] sm:$0xff]   ;;  %v1535_v39 = vld [vmem:[#allocation5 + $0x138] sm:$0xff]  }
  0x3f   :  { %1348 = vmatpush3.bf16.msra.mxu1 %v1509_v11  ;;  %v82_v36 = vld [vmem:[#allocation2 + $0x8] sm:$0xff]  ;;  %800 = vmatprep.mubr.bf16.mxu0 %v1214_v33  ;;  %v1536_v40 = vld [vmem:[#allocation5 + $0x1f8] sm:$0xff]   ;;  %v1538_v42 = vld [vmem:[#allocation5 + $0x170] sm:$0xff]  }
  0x40   :  { %1349 = vmatprep.subr.bf16.mxu1 %v1512_v14  ;;  %v1215_v37 = vcombine.low %v82_v36, %v82_v36  ;;  %v1216_v38 = vcombine.high %v82_v36, %v82_v36  ;;  %v1537_v41 = vld [vmem:[#allocation5 + $0x1b8] sm:$0xff]   ;;  %v1539_v43 = vld [vmem:[#allocation5 + $0x130] sm:$0xff]   ;;  %v1542_v46 = vld [vmem:[#allocation5 + $0x168] sm:$0xff]  }
  0x41   :  { %1328 = vmatpush3.bf16.msra.mxu0 %v1511_v13  ;;  %v1540_v44 = vld [vmem:[#allocation5 + $0x1f0] sm:$0xff]   ;;  %v1543_v47 = vld [vmem:[#allocation5 + $0x128] sm:$0xff]   ;;  %v1546_v50 = vld [vmem:[#allocation5 + $0x160] sm:$0xff]  }
  0x42   :  { %1329 = vmatprep.subr.bf16.mxu0 %v1514_v16  ;;  %840 = vmatprep.mubr.bf16.mxu1 %v1216_v38  ;;  %v1541_v45 = vld [vmem:[#allocation5 + $0x1b0] sm:$0xff]   ;;  %v1544_v48 = vld [vmem:[#allocation5 + $0x1e8] sm:$0xff]   ;;  %v1547_v51 = vld [vmem:[#allocation5 + $0x120] sm:$0xff]  }
  0x43   :  { %1350 = vmatpush3.bf16.msra.mxu1 %v1513_v15  ;;  %v1545_v49 = vld [vmem:[#allocation5 + $0x1a8] sm:$0xff]   ;;  %v1548_v52 = vld [vmem:[#allocation5 + $0x1e0] sm:$0xff]   ;;  %v1550_v54 = vld [vmem:[#allocation5 + $0x158] sm:$0xff]  }
  0x44   :  { %1351 = vmatprep.subr.bf16.mxu1 %v1516_v18  ;;  %v1549_v53 = vld [vmem:[#allocation5 + $0x1a0] sm:$0xff]   ;;  %v1551_v55 = vld [vmem:[#allocation5 + $0x118] sm:$0xff]   ;;  %v1554_v58 = vld [vmem:[#allocation5 + $0x150] sm:$0xff]  }
  0x45   :  { %1330 = vmatpush3.bf16.msra.mxu0 %v1515_v17  ;;  %v1552_v56 = vld [vmem:[#allocation5 + $0x1d8] sm:$0xff]   ;;  %v1555_v59 = vld [vmem:[#allocation5 + $0x110] sm:$0xff]   ;;  %v1558_v62 = vld [vmem:[#allocation5 + $0x148] sm:$0xff]  }
  0x46   :  { %1331 = vmatprep.subr.bf16.mxu0 %v1518_v20  ;;  %v1553_v57 = vld [vmem:[#allocation5 + $0x198] sm:$0xff]   ;;  %v1556_v60 = vld [vmem:[#allocation5 + $0x1d0] sm:$0xff]   ;;  %v1559_v63 = vld [vmem:[#allocation5 + $0x108] sm:$0xff]  }
  0x47   :  { %1352 = vmatpush3.bf16.msra.mxu1 %v1517_v19  ;;  %v1557_v61 = vld [vmem:[#allocation5 + $0x190] sm:$0xff]   ;;  %v1560_v0 = vld [vmem:[#allocation5 + $0x1c8] sm:$0xff]   ;;  %v1562_v2 = vld [vmem:[#allocation5 + $0x140] sm:$0xff]  }
  0x48   :  { %1353 = vmatprep.subr.bf16.mxu1 %v1520_v22  ;;  %v1561_v1 = vld [vmem:[#allocation5 + $0x188] sm:$0xff]   ;;  %v1563_v3 = vld [vmem:[#allocation5 + $0x100] sm:$0xff]   ;;  %v1568_v9 = vld [vmem:[#allocation5 + $0x278] sm:$0xff]  }
  0x49   :  { %1332 = vmatpush3.bf16.msra.mxu0 %v1519_v21  ;;  %v1564_v4 = vld [vmem:[#allocation5 + $0x1c0] sm:$0xff]   ;;  %v83_v5 = vld [vmem:[#allocation2 + $0x10] sm:$0xff]  ;;  %v84_v10 = vld [vmem:[#allocation2 + $0x18] sm:$0xff] }
  0x4a   :  { %1333 = vmatprep.subr.bf16.mxu0 %v1522_v24  ;;  %v1217_v6 = vcombine.low %v83_v5, %v83_v5  ;;  %v1218_v7 = vcombine.high %v83_v5, %v83_v5  ;;  %v1567_v8 = vld [vmem:[#allocation5 + $0x180] sm:$0xff]   ;;  %v1219_v11 = vcombine.low %v84_v10, %v84_v10  ;;  %v1220_v12 = vcombine.high %v84_v10, %v84_v10  ;;  %v1571_v13 = vld [vmem:[#allocation5 + $0x238] sm:$0xff]   ;;  %v1572_v14 = vld [vmem:[#allocation5 + $0x270] sm:$0xff]  }
  0x4b   :  { %1354 = vmatpush3.bf16.msra.mxu1 %v1521_v23  ;;  %v1573_v15 = vld [vmem:[#allocation5 + $0x230] sm:$0xff]   ;;  %v1574_v16 = vld [vmem:[#allocation5 + $0x268] sm:$0xff]   ;;  %v1576_v18 = vld [vmem:[#allocation5 + $0x260] sm:$0xff]  }
  0x4c   :  { %1355 = vmatprep.subr.bf16.mxu1 %v1524_v26  ;;  %v1575_v17 = vld [vmem:[#allocation5 + $0x228] sm:$0xff]   ;;  %v1577_v19 = vld [vmem:[#allocation5 + $0x220] sm:$0xff]   ;;  %v1578_v20 = vld [vmem:[#allocation5 + $0x258] sm:$0xff]  }
  0x4d   :  { %1334 = vmatpush3.bf16.msra.mxu0 %v1523_v25  ;;  %v1579_v21 = vld [vmem:[#allocation5 + $0x218] sm:$0xff]   ;;  %v1580_v22 = vld [vmem:[#allocation5 + $0x250] sm:$0xff]   ;;  %v1582_v26 = vld [vmem:[#allocation5 + $0x248] sm:$0xff]  }
  0x4e   :  { %1335 = vmatprep.subr.bf16.mxu0 %v1526_v28  ;;  %v85_v23 = vld [vmem:[#allocation2 + $0x20] sm:$0xff]  ;;  %v1581_v25 = vld [vmem:[#allocation5 + $0x210] sm:$0xff]   ;;  %v1584_v28 = vld [vmem:[#allocation5 + $0x240] sm:$0xff]  }
  0x4f   :  { %1356 = vmatpush3.bf16.msra.mxu1 %v1525_v27  ;;  %v1222_v24 = vcombine.high %v85_v23, %v85_v23  ;;  %v1583_v27 = vld [vmem:[#allocation5 + $0x208] sm:$0xff]   ;;  %v1588_v31 = vld [vmem:[#allocation7 + $0x38] sm:$0xff]   ;;  %v1589_v33 = vld [vmem:[#allocation7 + $0x30] sm:$0xff]  }
  0x50   :  { %1357 = vmatprep.subr.bf16.mxu1 %v1528_v30  ;;  %v1221_v30 = vcombine.low %v85_v23, %v85_v23  ;;  %v1592_v36 = vld [vmem:[#allocation7 + $0x18] sm:$0xff]   ;;  %v1594_v38 = vld [vmem:[#allocation7 + $0x8] sm:$0xff]  }
  0x51   :  { %1336 = vmatpush3.bf16.msra.mxu0 %v1527_v29  ;;  %v1585_v29 = vld [vmem:[#allocation5 + $0x200] sm:$0xff]  }
  0x52   :  { %1365 = vmatprep.subr.bf16.mxu0 %v1532_v35  ;;  %v1591_v35 = vld [vmem:[#allocation7 + $0x20] sm:$0xff]  }
  0x53   :  { %1358 = vmatpush3.bf16.msra.mxu1 %v1531_v34  ;;  %v1590_v34 = vld [vmem:[#allocation7 + $0x28] sm:$0xff]  }
  0x54   :  { %801 = vmatmul.mubr.bf16.vlgmr.msra.gmra.mxu0 %v1213_v32  ;;  %1387 = vmatprep.subr.bf16.mxu1 %v1536_v40  ;;  %v1718_v32 = vmov 0.0   ;;  %v1596_v40 = vld [vmem:[#allocation8 + $0x38] sm:$0xff]  }
  0x55   :  { %1366 = vmatpush3.bf16.msra.mxu0 %v1535_v39  ;;  %880 = vmatprep.mubr.bf16.mxu0 %v1218_v7  ;;  %v1595_v39 = vld [vmem:[#allocation7] sm:$0xff]  }
  0x56   :  { %841 = vmatmul.mubr.bf16.vlgmr.msra.gmra.mxu1 %v1215_v37  ;;  %1367 = vmatprep.subr.bf16.mxu0 %v1538_v42  ;;  %v1593_v37 = vld [vmem:[#allocation7 + $0x10] sm:$0xff]   ;;  %v1598_v42 = vld [vmem:[#allocation8 + $0x28] sm:$0xff]  }
  0x57   :  { %1388 = vmatpush3.bf16.msra.mxu1 %v1537_v41  ;;  %920 = vmatprep.mubr.bf16.mxu1 %v1220_v12  ;;  %v1597_v41 = vld [vmem:[#allocation8 + $0x30] sm:$0xff]  }
  0x58   :  { %1389 = vmatprep.subr.bf16.mxu1 %v1540_v44  ;;  %v1600_v44 = vld [vmem:[#allocation8 + $0x18] sm:$0xff]  }
  0x59   :  { %1368 = vmatpush3.bf16.msra.mxu0 %v1539_v43  ;;  %v1599_v43 = vld [vmem:[#allocation8 + $0x20] sm:$0xff]  }
  0x5a   :  { %1369 = vmatprep.subr.bf16.mxu0 %v1542_v46 }
  0x5b   :  { %1390 = vmatpush3.bf16.msra.mxu1 %v1541_v45  ;;  %v1601_v45 = vld [vmem:[#allocation8 + $0x10] sm:$0xff]  }
  0x5c   :  { %1391 = vmatprep.subr.bf16.mxu1 %v1544_v48 }
  0x5d   :  { %1370 = vmatpush3.bf16.msra.mxu0 %v1543_v47 }
  0x5e   :  { %1371 = vmatprep.subr.bf16.mxu0 %v1546_v50 }
  0x5f   :  { %1392 = vmatpush3.bf16.msra.mxu1 %v1545_v49 }
  0x60   :  { %1393 = vmatprep.subr.bf16.mxu1 %v1548_v52 }
  0x61   :  { %1372 = vmatpush3.bf16.msra.mxu0 %v1547_v51 }
  0x62   :  { %1373 = vmatprep.subr.bf16.mxu0 %v1550_v54 }
  0x63   :  { %1394 = vmatpush3.bf16.msra.mxu1 %v1549_v53 }
  0x64   :  { %1395 = vmatprep.subr.bf16.mxu1 %v1552_v56 }
  0x65   :  { %1374 = vmatpush3.bf16.msra.mxu0 %v1551_v55 }
  0x66   :  { %1375 = vmatprep.subr.bf16.mxu0 %v1554_v58 }
  0x67   :  { %1396 = vmatpush3.bf16.msra.mxu1 %v1553_v57 }
  0x68   :  { %1397 = vmatprep.subr.bf16.mxu1 %v1556_v60 }
  0x69   :  { %1376 = vmatpush3.bf16.msra.mxu0 %v1555_v59 }
  0x6a   :  { %1377 = vmatprep.subr.bf16.mxu0 %v1558_v62 }
  0x6b   :  { %1398 = vmatpush3.bf16.msra.mxu1 %v1557_v61 }
  0x6c   :  { %1399 = vmatprep.subr.bf16.mxu1 %v1560_v0 }
  0x6d   :  { %1378 = vmatpush3.bf16.msra.mxu0 %v1559_v63  ;;  %v1212_v63 = vld [vmem:[%s1814_s2] ss:$0 sm:$0xff] }
  0x6e   :  { %1379 = vmatprep.subr.bf16.mxu0 %v1562_v2 }
  0x6f   :  { %1400 = vmatpush3.bf16.msra.mxu1 %v1561_v1 }
  0x70   :  { %1401 = vmatprep.subr.bf16.mxu1 %v1564_v4 }
  0x71   :  { %1380 = vmatpush3.bf16.msra.mxu0 %v1563_v3 }
  0x72   :  { %1409 = vmatprep.subr.bf16.mxu0 %v1568_v9 }
  0x73   :  { %1402 = vmatpush3.bf16.msra.mxu1 %v1567_v8 }
  0x74   :  { %881 = vmatmul.mubr.bf16.vlgmr.msra.gmra.mxu0 %v1217_v6  ;;  %1449 = vmatprep.subr.bf16.mxu1 %v1718_v32 }
  0x75   :  { %1410 = vmatpush3.bf16.msra.mxu0 %v1571_v13  ;;  %960 = vmatprep.mubr.bf16.mxu0 %v1222_v24 }
  0x76   :  { %921 = vmatmul.mubr.bf16.vlgmr.msra.gmra.mxu1 %v1219_v11  ;;  %1411 = vmatprep.subr.bf16.mxu0 %v1572_v14 }
  0x77   :  { %1450 = vmatpush3.bf16.msra.mxu1 %v1588_v31  ;;  %1465 = vmatprep.mubr.msk.bf16.mxu1 %vm1719_vm0, %v1718_v32 }
  0x78   :  { %1451 = vmatprep.subr.bf16.mxu1 %v1718_v32 }
  0x79   :  { %1412 = vmatpush3.bf16.msra.mxu0 %v1573_v15  ;;  %v1602_v15 = vld [vmem:[#allocation8 + $0x8] sm:$0xff]  }
  0x7a   :  { %1413 = vmatprep.subr.bf16.mxu0 %v1574_v16  ;;  %v1603_v16 = vld [vmem:[#allocation8] sm:$0xff]  }
  0x7b   :  { %1452 = vmatpush3.bf16.msra.mxu1 %v1589_v33 }
  0x7c   :  { %1453 = vmatprep.subr.bf16.mxu1 %v1718_v32 }
  0x7d   :  { %1414 = vmatpush3.bf16.msra.mxu0 %v1575_v17  ;;  %v1303_v17 = vld [vmem:[%s1816_s4] ss:$0 sm:$0xff]  ;;  %s1684_s4 = scalar_lea.vmem %s1202_s25, 128 }
  0x7e   :  { %1415 = vmatprep.subr.bf16.mxu0 %v1576_v18  ;;  %p1685_p6 = scmp.ne.s32.totalorder %s1202_s25, %s1684_s4  ;;  %p1690_p8 = scmp.lt.s32.totalorder %s1684_s4, %s1684_s4 }
  0x7f   :  { %1454 = vmatpush3.bf16.msra.mxu1 %v1590_v34 }
  0x80   :  { %1455 = vmatprep.subr.bf16.mxu1 %v1718_v32  ;;  %p1691_p9 = por %p1690_p8, %p1689_p7 }
  0x81   :  { %1416 = vmatpush3.bf16.msra.mxu0 %v1577_v19 }
  0x82   :  { %1417 = vmatprep.subr.bf16.mxu0 %v1578_v20  ;;  %p1692_p10 = pnand %p1691_p9, %p1685_p6 }
  0x83   :  { %1456 = vmatpush3.bf16.msra.mxu1 %v1591_v35 }
  0x84   :  { %1457 = vmatprep.subr.bf16.mxu1 %v1718_v32 }
  0x85   :  { %1418 = vmatpush3.bf16.msra.mxu0 %v1579_v21 }
  0x86   :  { %1419 = vmatprep.subr.bf16.mxu0 %v1580_v22 }
  0x87   :  { %1458 = vmatpush3.bf16.msra.mxu1 %v1592_v36 }
  0x88   :  { %1459 = vmatprep.subr.bf16.mxu1 %v1718_v32 }
  0x89   :  { %1420 = vmatpush3.bf16.msra.mxu0 %v1581_v25  ;;  %v1312_v25 = vld [vmem:[%s1818_s6] ss:$0 sm:$0xff] }
  0x8a   :  { %1421 = vmatprep.subr.bf16.mxu0 %v1582_v26 }
  0x8b   :  { %1460 = vmatpush3.bf16.msra.mxu1 %v1593_v37 }
  0x8c   :  { %1461 = vmatprep.subr.bf16.mxu1 %v1718_v32 }
  0x8d   :  { %1422 = vmatpush3.bf16.msra.mxu0 %v1583_v27 }
  0x8e   :  { %1423 = vmatprep.subr.bf16.mxu0 %v1584_v28 }
  0x8f   :  { %1462 = vmatpush3.bf16.msra.mxu1 %v1594_v38 }
  0x90   :  { %1463 = vmatprep.subr.bf16.mxu1 %v1718_v32 }
  0x91   :  { %1424 = vmatpush3.bf16.msra.mxu0 %v1585_v29 }
  0x92   :  { %1469 = vmatprep.subr.bf16.mxu0 %v1718_v32 }
  0x93   :  { %1464 = vmatpush3.bf16.msra.mxu1 %v1595_v39 }
  0x94   :  { %961 = vmatmul.mubr.bf16.vlgmr.msra.gmra.mxu0 %v1221_v30 }
  0x95   :  { %1485 = vmatprep.mubr.msk.bf16.mxu0 %vm1719_vm0, %v1718_v32  ;;  %1470 = vmatpush3.bf16.msra.mxu0 %v1596_v40 }
  0x96   :  { %1471 = vmatprep.subr.bf16.mxu0 %v1718_v32 }
  0x99   :  { %1472 = vmatpush3.bf16.msra.mxu0 %v1597_v41 }
  0x9a   :  { %1473 = vmatprep.subr.bf16.mxu0 %v1718_v32 }
  0x9d   :  { %1474 = vmatpush3.bf16.msra.mxu0 %v1598_v42 }
  0x9e   :  { %1475 = vmatprep.subr.bf16.mxu0 %v1718_v32 }
  0xa1   :  { %1476 = vmatpush3.bf16.msra.mxu0 %v1599_v43 }
  0xa2   :  { %1477 = vmatprep.subr.bf16.mxu0 %v1718_v32 }
  0xa5   :  { %1478 = vmatpush3.bf16.msra.mxu0 %v1600_v44 }
  0xa6   :  { %1479 = vmatprep.subr.bf16.mxu0 %v1718_v32 }
  0xa9   :  { %1480 = vmatpush3.bf16.msra.mxu0 %v1601_v45 }
  0xaa   :  { %1481 = vmatprep.subr.bf16.mxu0 %v1718_v32 }
  0xad   :  { %1482 = vmatpush3.bf16.msra.mxu0 %v1602_v15 }
  0xae   :  { %1483 = vmatprep.subr.bf16.mxu0 %v1718_v32 }
  0xb1   :  { %1484 = vmatpush3.bf16.msra.mxu0 %v1603_v16 }
 0x114   :  { %v1337_v46 = vpop.f32.mrf.mxu0 }
 0x116   :  { %v1338_v47 = vpop.f32.mrf.mxu0  ;;  %v1359_v48 = vpop.f32.mrf.mxu1 }
 0x117   :  { %v1339_v62 = vadd.f32 %v1338_v47, %v1337_v46 }
 0x118   :  { %v1340_v49 = vpop.f32.mrf.mxu0  ;;  %v1360_v50 = vpop.f32.mrf.mxu1 }
 0x119   :  { %v803_v0 = vadd.f32 %v1339_v62, %v1212_v63  ;;  %v1361_v1 = vadd.f32 %v1360_v50, %v1359_v48 }
 0x11a   :  { %v1341_v51 = vpop.f32.mrf.mxu0  ;;  %v1362_v52 = vpop.f32.mrf.mxu1 }
 0x11b   :  { %v843_v3 = vadd.f32 %v1361_v1, %v803_v0 }
 0x11c   :  { %v1363_v53 = vpop.f32.mrf.mxu1 }
 0x134   :  { %v1381_v54 = vpop.f32.mrf.mxu0 }
 0x136   :  { %v1382_v55 = vpop.f32.mrf.mxu0  ;;  %v1403_v56 = vpop.f32.mrf.mxu1 }
 0x137   :  { %v1383_v2 = vadd.f32 %v1382_v55, %v1381_v54 }
 0x138   :  { %v1384_v57 = vpop.f32.mrf.mxu0  ;;  %v1404_v58 = vpop.f32.mrf.mxu1 }
 0x139   :  { %v883_v4 = vadd.f32 %v1383_v2, %v843_v3  ;;  %v1405_v5 = vadd.f32 %v1404_v58, %v1403_v56 }
 0x13a   :  { %v1385_v59 = vpop.f32.mrf.mxu0  ;;  %v1406_v60 = vpop.f32.mrf.mxu1 }
 0x13b   :  { %v923_v8 = vadd.f32 %v1405_v5, %v883_v4 }
 0x13c   :  { %v1407_v61 = vpop.f32.mrf.mxu1 }
 0x154   :  { %v1425_v6 = vpop.f32.mrf.mxu0 }
 0x156   :  { %v1426_v7 = vpop.f32.mrf.mxu0 }
 0x157   :  { %v1427_v9 = vadd.f32 %v1426_v7, %v1425_v6 }
 0x158   :  { %v1428_v10 = vpop.f32.mrf.mxu0 }
 0x159   :  { %v963_v11 = vadd.f32 %v1427_v9, %v923_v8 }
 0x15a   :  { %v1429_v12 = vpop.f32.mrf.mxu0 }
 0x15b   :  { %v968_v13 = vmax.f32 %v963_v11, 0.0 }
 0x15d   :  { %v969_v14 = vpack.c.bf16 %v968_v13, %v968_v13 }
 0x15f   :  { %1466 = vmatmul.mubr.bf16.vlgmr.msra.gmra.mxu1 %v969_v14 }
 0x21f   :  { %v1075_v18 = vpop.f32.mrf.mxu1 }
 0x220   :  { %v1076_v19 = vadd.f32 %v1303_v17, %v1075_v18 }
 0x221   :  { %v1467_v20 = vpop.f32.mrf.mxu1 }
 0x222   :  { %v1081_v21 = vmax.f32 %v1076_v19, 0.0 }
 0x223   :  { %v1078_v22 = vpop.f32.mrf.mxu1 }
 0x224   :  { %v1082_v23 = vpack.c.bf16 %v1081_v21, %v1081_v21 }
 0x225   :  { %v1468_v24 = vpop.f32.mrf.mxu1 }
 0x226   :  { %1486 = vmatmul.mubr.bf16.vlgmr.msra.gmra.mxu0 %v1082_v23 }
 0x2e6   :  { %v1188_v26 = vpop.f32.mrf.mxu0 }
 0x2e7   :  { %v1189_v27 = vadd.f32 %v1312_v25, %v1188_v26 }
 0x2e8   :  { %v1487_v28 = vpop.f32.mrf.mxu0 }
 0x2e9   :  { %1194 = vst [vmem:[#allocation10] sm:$0xff] %v1189_v27 }
 0x2ea   :  { %v1191_v29 = vpop.f32.mrf.mxu0 }
 0x2eb   :  { %1695 = shalt.err (!%p1692_p10)
}
 0x2ec   :  { %1204 = dma.vmem_to_hbm [thread:$0]  %s1202_s25, 128, %s1819_s7, [#allocation4]   ;;  %v1488_v30 = vpop.f32.mrf.mxu0 }
 0x2ed   :  { %1710 = dma.done.wait [#allocation4], 128  }
 0x2ee   :  { %1711 = vsyncadd [#allocation4], 4294967168 }
 0x2ef   :  { %1208 = vsyncpa [#allocation3], 1 }
 0x2f0   :  { %1209 = vsyncpa [#allocation6], 1 }
 0x2f1   :  { %1210 = vsyncpa [#allocation9], 1 }
 0x2f2   :  { %1211 = vsyncpa [#allocation4], 1 }

</bundles_post_ra>
